<compile_context>
chip_gen: v7x
topology: tpu7x:2x2x1
jax: 0.10.0
libtpu: 0.0.40
codegen_flags: <defaults>
</compile_context>

<pallas_src>
import jax
import jax.numpy as jnp
from jax.experimental import pallas as pl
from jax.experimental.pallas import tpu as pltpu


_LANE = 128
_X_STEP_BYTES = 4 * 1024 * 1024   # target x bytes per grid step
_TB_CAP = 2048                    # max batch-tile rows


def _round_up(x, m):
    return ((x + m - 1) // m) * m


def _linear_kernel(x_ref, w_ref, b_ref, o_ref):
    # (TB, D) @ (D, C_pad) on the MXU with f32 accumulation, one broadcast bias
    # add in f32, cast to output dtype, lane-dense store.
    acc = jnp.dot(x_ref[...], w_ref[...], preferred_element_type=jnp.float32)
    o_ref[...] = (acc + b_ref[...]).astype(o_ref.dtype)


def prepare_linear_params(weight_t, bias):
    """One-time parameter prep (hoisted out of the per-call path).

    Args:
      weight_t: (D, num_classes) — torch weight (num_classes, D) pre-transposed.
      bias:     (num_classes,).

    Returns:
      w_padded: (D, C_pad) with C_pad a multiple of 128, zero-padded lanes.
      b_padded: (1, C_pad) f32 bias row, zero-padded lanes.
    """
    d, c = weight_t.shape
    c_pad = _round_up(max(c, _LANE), _LANE)
    w_padded = jnp.pad(weight_t, ((0, 0), (0, c_pad - c)))
    b_padded = jnp.pad(bias.astype(jnp.float32), (0, c_pad - c)).reshape(1, c_pad)
    return w_padded, b_padded


def linear_classifier_forward(x_nchw, w_padded, b_padded, num_classes,
                              *, return_padded=False):
    """Forward pass of LinearClassifier.

    Args:
      x_nchw:     (b, 3, H, W) input image batch (f32 or bf16).
      w_padded:   (D, C_pad) from prepare_linear_params.
      b_padded:   (1, C_pad) f32 from prepare_linear_params.
      num_classes: true number of classes (C_pad is the padded lane width).
      return_padded: if True, skip the post-kernel slice and return the
        (b_sub, C_pad) block (consumer slices), saving one small HBM pass.

    Returns:
      (b, num_classes) logits, same dtype as x (or padded block if requested).
    """
    out_dtype = x_nchw.dtype
    b = x_nchw.shape[0]
    d, c_pad = w_padded.shape

    # Flatten exactly like torch's .view(b, -1) on contiguous NCHW.
    x_flat = x_nchw.reshape(b, d)

    in_bytes = jnp.dtype(x_flat.dtype).itemsize
    w_bytes = jnp.dtype(w_padded.dtype).itemsize
    out_bytes = jnp.dtype(out_dtype).itemsize

    # Sublane row multiple: 8 for 4-byte dtypes, 16 for bf16, 32 for int8.
    sub = max(8, 32 // in_bytes)

    # Pad the batch only up to the sublane multiple (no-op for typical batches).
    b_sub = _round_up(b, sub)
    if b_sub != b:
        x_flat = jnp.pad(x_flat, ((0, b_sub - b), (0, 0)))

    # Batch tile: ~4 MiB of x per step, capped, and kept small enough that the
    # parallel batch axis has >= 2 tiles whenever the batch allows (v7x 2 TCs).
    tb = max(sub, (_X_STEP_BYTES // (d * in_bytes)) // sub * sub)
    tb = min(tb, _TB_CAP)
    if b_sub >= 2 * sub:
        tb = min(tb, _round_up(pl.cdiv(b_sub, 2), sub))
    else:
        tb = sub

    grid = (pl.cdiv(b_sub, tb),)

    # Explicit VMEM accounting: double-buffered x tile, single-buffered weight
    # and bias (constant index_map, pl.Buffered(1)), double-buffered output.
    vmem_bytes = (2 * tb * d * in_bytes
                  + d * c_pad * w_bytes
                  + c_pad * 4
                  + 2 * tb * c_pad * out_bytes)
    vmem_limit = int(vmem_bytes * 1.25) + (2 << 20)

    cost = pl.CostEstimate(
        flops=2 * grid[0] * tb * d * c_pad,
        transcendentals=0,
        bytes_accessed=(b_sub * d * in_bytes
                        + d * c_pad * w_bytes
                        + c_pad * 4
                        + b_sub * c_pad * out_bytes),
    )

    out = pl.pallas_call(
        _linear_kernel,
        out_shape=jax.ShapeDtypeStruct((b_sub, c_pad), out_dtype),
        grid=grid,
        in_specs=[
            # x batch tile: pipelined (double-buffered by default).
            pl.BlockSpec((tb, d), lambda i: (i, 0)),
            # weight: constant block -> resident in VMEM, single buffer.
            pl.BlockSpec((d, c_pad), lambda i: (0, 0),
                         pipeline_mode=pl.Buffered(1)),
            # bias row: resident, single buffer.
            pl.BlockSpec((1, c_pad), lambda i: (0, 0),
                         pipeline_mode=pl.Buffered(1)),
        ],
        out_specs=pl.BlockSpec((tb, c_pad), lambda i: (i, 0)),
        compiler_params=pltpu.CompilerParams(
            dimension_semantics=("parallel",),   # shard batch tiles across TCs
            vmem_limit_bytes=vmem_limit,
        ),
        cost_estimate=cost,
    )(x_flat, w_padded, b_padded)

    if return_padded:
        return out
    # Slice off padded batch rows and padded class lanes outside the kernel.
    return out[:b, :num_classes]


if __name__ == "__main__":
    # Small shapes consistent with the module: h = w = 16 -> D = 3*16*16 = 768.
    batch, h, w, num_classes = 2, 16, 16, 6
    d = 3 * h * w

    key = jax.random.PRNGKey(0)
    kx, kw, kb = jax.random.split(key, 3)

    # PyTorch-style uniform(-1/sqrt(D), 1/sqrt(D)) params; weight kept
    # pre-transposed as (D, num_classes) so the kernel does x @ W_t directly.
    bound = 1.0 / jnp.sqrt(jnp.float32(d))
    weight_t = jax.random.uniform(kw, (d, num_classes), jnp.float32, -bound, bound)
    bias = jax.random.uniform(kb, (num_classes,), jnp.float32, -bound, bound)

    x = jax.random.normal(kx, (batch, 3, h, w), jnp.float32)

    # One-time parameter preparation (pad class dim to 128 lanes).
    w_padded, b_padded = prepare_linear_params(weight_t, bias)

    logits = linear_classifier_forward(x, w_padded, b_padded, num_classes)
    logits = jax.block_until_ready(logits)

    # Sanity check against plain-JAX reference.
    ref = x.reshape(batch, -1) @ weight_t + bias
    assert logits.shape == (batch, num_classes)
    assert jnp.allclose(logits, ref, atol=1e-4, rtol=1e-4)

    print("KERNEL_OK")
</pallas_src>

<mosaic_0001>
module attributes {stable_mosaic.version = 11 : i64} {
  func.func @_linear_kernel(%arg0: i32, %arg1: memref<8x768xf32, #tpu.memory_space<vmem>>, %arg2: memref<768x128xf32, #tpu.memory_space<vmem>>, %arg3: memref<1x128xf32, #tpu.memory_space<vmem>>, %arg4: memref<8x128xf32, #tpu.memory_space<vmem>>) attributes {dimension_semantics = [#tpu.dimension_semantics<parallel>], iteration_bounds = array<i64: 1>, scalar_prefetch = 0 : i64, scratch_operands = 0 : i64, tpu.core_type = #tpu.core_type<tc>, window_params = [{transform_indices = @transform_0, window_bounds = array<i64: 8, 768>}, {pipeline_mode = #tpu.pipeline_mode<synchronous>, transform_indices = @transform_1, window_bounds = array<i64: 768, 128>}, {pipeline_mode = #tpu.pipeline_mode<synchronous>, transform_indices = @transform_2, window_bounds = array<i64: 1, 128>}, {transform_indices = @transform_3, window_bounds = array<i64: 8, 128>}]} {
    %c0 = arith.constant 0 : index
    %c0_0 = arith.constant 0 : index
    %0 = vector.load %arg1[%c0, %c0_0] : memref<8x768xf32, #tpu.memory_space<vmem>>, vector<8x768xf32>
    %c0_1 = arith.constant 0 : index
    %c0_2 = arith.constant 0 : index
    %1 = vector.load %arg2[%c0_1, %c0_2] : memref<768x128xf32, #tpu.memory_space<vmem>>, vector<768x128xf32>
    %cst = arith.constant dense<0.000000e+00> : vector<8x128xf32>
    %2 = tpu.matmul %0, %1, %cst {dimension_numbers = #tpu.dot_dimension_numbers<[1], [0], [0], [1], [0, 0, 1, 1], [], []>} : vector<8x768xf32>, vector<768x128xf32>, vector<8x128xf32> -> vector<8x128xf32>
    %c0_3 = arith.constant 0 : index
    %c0_4 = arith.constant 0 : index
    %3 = vector.load %arg3[%c0_3, %c0_4] : memref<1x128xf32, #tpu.memory_space<vmem>>, vector<1x128xf32>
    %4 = vector.broadcast %3 : vector<1x128xf32> to vector<8x128xf32>
    %5 = arith.addf %2, %4 : vector<8x128xf32>
    %c0_5 = arith.constant 0 : index
    %c0_6 = arith.constant 0 : index
    %6 = vector.load %arg4[%c0_5, %c0_6] : memref<8x128xf32, #tpu.memory_space<vmem>>, vector<8x128xf32>
    tpu.vector_store %arg4[%c0_5, %c0_6], %5 {strides = array<i32>} : memref<8x128xf32, #tpu.memory_space<vmem>>, vector<8x128xf32>,
    return
  }
  func.func @transform_0(%arg0: i32) -> (i32, i32) {
    %c0_i32 = arith.constant 0 : i32
    %c0_i32_0 = arith.constant 0 : i32
    return %arg0, %c0_i32 : i32, i32
  }
  func.func @transform_1(%arg0: i32) -> (i32, i32) {
    %c0_i32 = arith.constant 0 : i32
    %c0_i32_0 = arith.constant 0 : i32
    %c0_i32_1 = arith.constant 0 : i32
    return %c0_i32, %c0_i32_0 : i32, i32
  }
  func.func @transform_2(%arg0: i32) -> (i32, i32) {
    %c0_i32 = arith.constant 0 : i32
    %c0_i32_0 = arith.constant 0 : i32
    %c0_i32_1 = arith.constant 0 : i32
    return %c0_i32, %c0_i32_0 : i32, i32
  }
  func.func @transform_3(%arg0: i32) -> (i32, i32) {
    %c0_i32 = arith.constant 0 : i32
    %c0_i32_0 = arith.constant 0 : i32
    return %arg0, %c0_i32 : i32, i32
  }
}

</mosaic_0001>

<bundles_post_ra>
// kernel: tpu_custom_call.1
= control target key start
LH: loop header
LB: loop body
LE: loop exit
PB: predicated region body
PF: predicated region fallthrough
CT: control target
= control target key end

     0   :  { %8 = vsyncpa [#allocation3], 0  ;;  %s727_s0 = inlined_call_operand.hbm [shape: f32[8,768], index: 0, kind: input, shape index: {}]   ;;  %s728_s1 = inlined_call_operand.hbm [shape: f32[768,128], index: 1, kind: input, shape index: {}]   ;;  %s729_s2 = inlined_call_operand.vmem [shape: f32[1,128], index: 2, kind: input, shape index: {}]   ;;  %s730_s3 = inlined_call_operand.hbm [shape: f32[8,128], index: 3, kind: output, shape index: {}]  }
   0x1   :  { %9 = vsyncpa [#allocation6], 0 }
   0x2   :  { %10 = vsyncpa [#allocation4], 0  ;;  %s656_s12 = smov [#allocation2]   ;;  %s657_s14 = smov [#allocation5]  }
   0x3   :  { %s17_s13 = sshll.u32 %s656_s12, 4  ;;  %s26_s15 = sshll.u32 %s657_s14, 4  ;;  %s18_s13 = int_to_ptr.vmem [resolvable:$true] %s17_s13  ;;  %s681_s15 = int_to_ptr.vmem [resolvable:$true] %s26_s15 }
   0x4   :  { %s584_s18 = scalar_lea.hbm %s727_s0, 768 }
   0x5   :  { %p585_p0 = scmp.ne.s32.totalorder %s727_s0, %s584_s18  ;;  %p588_p1 = scmp.lt.u32.totalorder %s584_s18, %s727_s0 }
   0x7   :  { %p590_p2 = pnand %p588_p1, %p585_p0 }
   0x9   :  { %593 = shalt.err (!%p590_p2)
}
   0xa   :  { %s594_s23 = scalar_lea.vmem %s18_s13, 768  ;;  %p599_p4 = scmp.lt.s32.totalorder %s18_s13, %s18_s13 }
   0xb   :  { %p595_p3 = scmp.ne.s32.totalorder %s18_s13, %s594_s23  ;;  %p600_p5 = scmp.lt.s32.totalorder %s594_s23, %s594_s23 }
   0xd   :  { %p601_p6 = por %p600_p5, %p599_p4 }
   0xf   :  { %p602_p7 = pnand %p601_p6, %p595_p3 }
  0x11   :  { %605 = shalt.err (!%p602_p7)
}
  0x12   :  { %20 = dma.hbm_to_vmem [thread:$0]  %s727_s0, 768, %s18_s13, [#allocation3]  }
  0x13   :  { %s606_s28 = scalar_lea.hbm %s728_s1, 12288 }
  0x14   :  { %p607_p8 = scmp.ne.s32.totalorder %s728_s1, %s606_s28  ;;  %p610_p9 = scmp.lt.u32.totalorder %s606_s28, %s728_s1 }
  0x16   :  { %p612_p10 = pnand %p610_p9, %p607_p8 }
  0x18   :  { %615 = shalt.err (!%p612_p10)
}
  0x19   :  { %s616_s6 = scalar_lea.vmem %s681_s15, 12288  ;;  %p621_p12 = scmp.lt.s32.totalorder %s681_s15, %s681_s15 }
  0x1a   :  { %p617_p11 = scmp.ne.s32.totalorder %s681_s15, %s616_s6  ;;  %p622_p13 = scmp.lt.s32.totalorder %s616_s6, %s616_s6 }
  0x1c   :  { %p623_p0 = por %p622_p13, %p621_p12 }
  0x1e   :  { %p624_p1 = pnand %p623_p0, %p617_p11 }
  0x20   :  { %627 = shalt.err (!%p624_p1)
}
  0x21   :  { %s658_s0 = smov 128   ;;  %s659_s7 = smov 8  }
  0x22   :  { %32 = dma.hbm_to_vmem [thread:$0]  %s728_s1, 12288, %s681_s15, [#allocation6], %s658_s0, %s658_s0, %s659_s7  }
  0x23   :  { %650 = dma.done.wait [#allocation3], 768  }
  0x24   :  { %651 = vsyncadd [#allocation3], 4294966528 }
  0x25   :  { %652 = dma.done.wait [#allocation6], 12288  }
  0x26   :  { %653 = vsyncadd [#allocation6], 4294955008  ;;  %v63_v0 = vld [vmem:[#allocation5 + $0x80] sm:$0xff]  ;;  %v64_v1 = vld [vmem:[#allocation5 + $0x88] sm:$0xff]  ;;  %s660_s11 = smov [#allocation7]  }
  0x27   :  { %v47_v2 = vld [vmem:[#allocation5] sm:$0xff]  ;;  %v483_v3 = vpack.c.bf16 %v64_v1, %v63_v0  ;;  %v48_v4 = vld [vmem:[#allocation5 + $0x8] sm:$0xff]  ;;  %v65_v11 = vld [vmem:[#allocation5 + $0x90] sm:$0xff]  ;;  %s367_s12 = sshll.u32 %s660_s11, 4  ;;  %s368_s12 = int_to_ptr.vmem [resolvable:$true] %s367_s12 }
  0x28   :  { %v95_v5 = vld [vmem:[#allocation5 + $0x180] sm:$0xff]  ;;  %v96_v6 = vld [vmem:[#allocation5 + $0x188] sm:$0xff]  ;;  %v485_v7 = vpack.c.bf16 %v48_v4, %v47_v2  ;;  %v66_v13 = vld [vmem:[#allocation5 + $0x98] sm:$0xff]  ;;  %s628_s13 = scalar_lea.vmem %s368_s12, 128  ;;  %p633_p3 = scmp.lt.s32.totalorder %s368_s12, %s368_s12 }
  0x29   :  { %v515_v8 = vpack.c.bf16 %v96_v6, %v95_v5  ;;  %v79_v9 = vld [vmem:[#allocation5 + $0x100] sm:$0xff]  ;;  %v80_v10 = vld [vmem:[#allocation5 + $0x108] sm:$0xff]  ;;  %484 = vmatprep.subr.bf16.mxu0 %v483_v3  ;;  %v49_v14 = vld [vmem:[#allocation5 + $0x10] sm:$0xff]  ;;  %v487_v16 = vpack.c.bf16 %v66_v13, %v65_v11  ;;  %p629_p2 = scmp.ne.s32.totalorder %s368_s12, %s628_s13  ;;  %p634_p4 = scmp.lt.s32.totalorder %s628_s13, %s628_s13 }
  0x2a   :  { %v517_v12 = vpack.c.bf16 %v80_v10, %v79_v9  ;;  %v50_v15 = vld [vmem:[#allocation5 + $0x18] sm:$0xff]  ;;  %486 = vmatpush3.bf16.msra.mxu0 %v485_v7  ;;  %v97_v18 = vld [vmem:[#allocation5 + $0x190] sm:$0xff]  ;;  %v67_v23 = vld [vmem:[#allocation5 + $0xa0] sm:$0xff] }
  0x2b   :  { %516 = vmatprep.subr.bf16.mxu1 %v515_v8  ;;  %v489_v17 = vpack.c.bf16 %v50_v15, %v49_v14  ;;  %v98_v19 = vld [vmem:[#allocation5 + $0x198] sm:$0xff]  ;;  %v81_v20 = vld [vmem:[#allocation5 + $0x110] sm:$0xff]  ;;  %v68_v24 = vld [vmem:[#allocation5 + $0xa8] sm:$0xff]  ;;  %488 = vmatprep.subr.bf16.mxu0 %v487_v16  ;;  %p635_p5 = por %p634_p4, %p633_p3 }
  0x2c   :  { %518 = vmatpush3.bf16.msra.mxu1 %v517_v12  ;;  %v519_v21 = vpack.c.bf16 %v98_v19, %v97_v18  ;;  %v82_v22 = vld [vmem:[#allocation5 + $0x118] sm:$0xff]  ;;  %v491_v26 = vpack.c.bf16 %v68_v24, %v67_v23  ;;  %v51_v27 = vld [vmem:[#allocation5 + $0x20] sm:$0xff]  ;;  %v52_v28 = vld [vmem:[#allocation5 + $0x28] sm:$0xff] }
  0x2d   :  { %v521_v25 = vpack.c.bf16 %v82_v22, %v81_v20  ;;  %v99_v29 = vld [vmem:[#allocation5 + $0x1a0] sm:$0xff]  ;;  %v100_v30 = vld [vmem:[#allocation5 + $0x1a8] sm:$0xff]  ;;  %v493_v33 = vpack.c.bf16 %v52_v28, %v51_v27  ;;  %v69_v35 = vld [vmem:[#allocation5 + $0xb0] sm:$0xff]  ;;  %p636_p6 = pnand %p635_p5, %p629_p2 }
  0x2e   :  { %520 = vmatprep.subr.bf16.mxu1 %v519_v21  ;;  %v83_v31 = vld [vmem:[#allocation5 + $0x120] sm:$0xff]  ;;  %v84_v32 = vld [vmem:[#allocation5 + $0x128] sm:$0xff]  ;;  %490 = vmatpush3.bf16.msra.mxu0 %v489_v17  ;;  %v523_v34 = vpack.c.bf16 %v100_v30, %v99_v29  ;;  %v70_v36 = vld [vmem:[#allocation5 + $0xb8] sm:$0xff] }
  0x2f   :  { %v53_v37 = vld [vmem:[#allocation5 + $0x30] sm:$0xff]  ;;  %492 = vmatprep.subr.bf16.mxu0 %v491_v26  ;;  %v525_v38 = vpack.c.bf16 %v84_v32, %v83_v31  ;;  %v495_v39 = vpack.c.bf16 %v70_v36, %v69_v35  ;;  %v54_v40 = vld [vmem:[#allocation5 + $0x38] sm:$0xff]  ;;  %v71_v46 = vld [vmem:[#allocation5 + $0xc0] sm:$0xff] }
  0x30   :  { %522 = vmatpush3.bf16.msra.mxu1 %v521_v25  ;;  %v101_v41 = vld [vmem:[#allocation5 + $0x1b0] sm:$0xff]  ;;  %v102_v42 = vld [vmem:[#allocation5 + $0x1b8] sm:$0xff]  ;;  %v72_v47 = vld [vmem:[#allocation5 + $0xc8] sm:$0xff]  ;;  %v497_v48 = vpack.c.bf16 %v54_v40, %v53_v37 }
  0x31   :  { %524 = vmatprep.subr.bf16.mxu1 %v523_v34  ;;  %v527_v43 = vpack.c.bf16 %v102_v42, %v101_v41  ;;  %v85_v44 = vld [vmem:[#allocation5 + $0x130] sm:$0xff]  ;;  %v86_v45 = vld [vmem:[#allocation5 + $0x138] sm:$0xff]  ;;  %v103_v49 = vld [vmem:[#allocation5 + $0x1c0] sm:$0xff]  ;;  %v499_v52 = vpack.c.bf16 %v72_v47, %v71_v46 }
  0x32   :  { %494 = vmatpush3.bf16.msra.mxu0 %v493_v33  ;;  %v104_v50 = vld [vmem:[#allocation5 + $0x1c8] sm:$0xff]  ;;  %v529_v51 = vpack.c.bf16 %v86_v45, %v85_v44  ;;  %v55_v53 = vld [vmem:[#allocation5 + $0x40] sm:$0xff]  ;;  %v73_v58 = vld [vmem:[#allocation5 + $0xd0] sm:$0xff] }
  0x33   :  { %496 = vmatprep.subr.bf16.mxu0 %v495_v39  ;;  %v56_v54 = vld [vmem:[#allocation5 + $0x48] sm:$0xff]  ;;  %v87_v55 = vld [vmem:[#allocation5 + $0x140] sm:$0xff]  ;;  %v531_v56 = vpack.c.bf16 %v104_v50, %v103_v49  ;;  %v74_v59 = vld [vmem:[#allocation5 + $0xd8] sm:$0xff] }
  0x34   :  { %526 = vmatpush3.bf16.msra.mxu1 %v525_v38  ;;  %v88_v57 = vld [vmem:[#allocation5 + $0x148] sm:$0xff]  ;;  %v105_v60 = vld [vmem:[#allocation5 + $0x1d0] sm:$0xff]  ;;  %v106_v61 = vld [vmem:[#allocation5 + $0x1d8] sm:$0xff]  ;;  %v501_v62 = vpack.c.bf16 %v56_v54, %v55_v53  ;;  %v503_v0 = vpack.c.bf16 %v74_v59, %v73_v58 }
  0x35   :  { %528 = vmatprep.subr.bf16.mxu1 %v527_v43  ;;  %v533_v63 = vpack.c.bf16 %v88_v57, %v87_v55  ;;  %v57_v1 = vld [vmem:[#allocation5 + $0x50] sm:$0xff]  ;;  %v58_v2 = vld [vmem:[#allocation5 + $0x58] sm:$0xff]  ;;  %v535_v4 = vpack.c.bf16 %v106_v61, %v105_v60  ;;  %v75_v6 = vld [vmem:[#allocation5 + $0xe0] sm:$0xff] }
  0x36   :  { %498 = vmatpush3.bf16.msra.mxu0 %v497_v48  ;;  %v89_v3 = vld [vmem:[#allocation5 + $0x150] sm:$0xff]  ;;  %v90_v5 = vld [vmem:[#allocation5 + $0x158] sm:$0xff]  ;;  %v76_v7 = vld [vmem:[#allocation5 + $0xe8] sm:$0xff]  ;;  %v505_v10 = vpack.c.bf16 %v58_v2, %v57_v1 }
  0x37   :  { %500 = vmatprep.subr.bf16.mxu0 %v499_v52  ;;  %v107_v8 = vld [vmem:[#allocation5 + $0x1e0] sm:$0xff]  ;;  %v108_v9 = vld [vmem:[#allocation5 + $0x1e8] sm:$0xff]  ;;  %v42_v12 = vld [vmem:[#allocation2 + $0x8] sm:$0xff]  ;;  %v537_v13 = vpack.c.bf16 %v90_v5, %v89_v3  ;;  %v507_v14 = vpack.c.bf16 %v76_v7, %v75_v6 }
  0x38   :  { %530 = vmatpush3.bf16.msra.mxu1 %v529_v51  ;;  %v59_v11 = vld [vmem:[#allocation5 + $0x60] sm:$0xff]  ;;  %v60_v15 = vld [vmem:[#allocation5 + $0x68] sm:$0xff]  ;;  %v539_v18 = vpack.c.bf16 %v108_v9, %v107_v8  ;;  %v77_v19 = vld [vmem:[#allocation5 + $0xf0] sm:$0xff]  ;;  %214 = vmatprep.mubr.f32.mxu0 %v42_v12 }
  0x39   :  { %532 = vmatprep.subr.bf16.mxu1 %v531_v56  ;;  %v91_v16 = vld [vmem:[#allocation5 + $0x160] sm:$0xff]  ;;  %v92_v17 = vld [vmem:[#allocation5 + $0x168] sm:$0xff]  ;;  %v78_v20 = vld [vmem:[#allocation5 + $0xf8] sm:$0xff]  ;;  %v509_v24 = vpack.c.bf16 %v60_v15, %v59_v11 }
  0x3a   :  { %502 = vmatpush3.bf16.msra.mxu0 %v501_v62  ;;  %v44_v21 = vld [vmem:[#allocation2 + $0x18] sm:$0xff]  ;;  %v109_v22 = vld [vmem:[#allocation5 + $0x1f0] sm:$0xff]  ;;  %v110_v23 = vld [vmem:[#allocation5 + $0x1f8] sm:$0xff]  ;;  %v541_v25 = vpack.c.bf16 %v92_v17, %v91_v16  ;;  %v511_v26 = vpack.c.bf16 %v78_v20, %v77_v19 }
  0x3b   :  { %504 = vmatprep.subr.bf16.mxu0 %v503_v0  ;;  %284 = vmatprep.mubr.f32.mxu1 %v44_v21  ;;  %v61_v27 = vld [vmem:[#allocation5 + $0x70] sm:$0xff]  ;;  %v62_v28 = vld [vmem:[#allocation5 + $0x78] sm:$0xff]  ;;  %v543_v30 = vpack.c.bf16 %v110_v23, %v109_v22  ;;  %v127_v32 = vld [vmem:[#allocation5 + $0x280] sm:$0xff] }
  0x3c   :  { %534 = vmatpush3.bf16.msra.mxu1 %v533_v63  ;;  %v93_v29 = vld [vmem:[#allocation5 + $0x170] sm:$0xff]  ;;  %v94_v31 = vld [vmem:[#allocation5 + $0x178] sm:$0xff]  ;;  %v128_v33 = vld [vmem:[#allocation5 + $0x288] sm:$0xff]  ;;  %v513_v34 = vpack.c.bf16 %v62_v28, %v61_v27 }
  0x3d   :  { %536 = vmatprep.subr.bf16.mxu1 %v535_v4  ;;  %v545_v35 = vpack.c.bf16 %v94_v31, %v93_v29  ;;  %v547_v36 = vpack.c.bf16 %v128_v33, %v127_v32  ;;  %v111_v37 = vld [vmem:[#allocation5 + $0x200] sm:$0xff]  ;;  %v112_v38 = vld [vmem:[#allocation5 + $0x208] sm:$0xff]  ;;  %v129_v39 = vld [vmem:[#allocation5 + $0x290] sm:$0xff] }
  0x3e   :  { %506 = vmatpush3.bf16.msra.mxu0 %v505_v10  ;;  %v130_v40 = vld [vmem:[#allocation5 + $0x298] sm:$0xff]  ;;  %v41_v41 = vld [vmem:[#allocation2] sm:$0xff]  ;;  %v549_v42 = vpack.c.bf16 %v112_v38, %v111_v37  ;;  %v43_v43 = vld [vmem:[#allocation2 + $0x10] sm:$0xff] }
  0x3f   :  { %508 = vmatprep.subr.bf16.mxu0 %v507_v14  ;;  %v551_v44 = vpack.c.bf16 %v130_v40, %v129_v39  ;;  %v113_v45 = vld [vmem:[#allocation5 + $0x210] sm:$0xff]  ;;  %v114_v46 = vld [vmem:[#allocation5 + $0x218] sm:$0xff]  ;;  %v131_v47 = vld [vmem:[#allocation5 + $0x2a0] sm:$0xff] }
  0x40   :  { %538 = vmatpush3.bf16.msra.mxu1 %v537_v13  ;;  %v132_v48 = vld [vmem:[#allocation5 + $0x2a8] sm:$0xff]  ;;  %v46_v49 = vld [vmem:[#allocation2 + $0x28] sm:$0xff]  ;;  %v553_v50 = vpack.c.bf16 %v114_v46, %v113_v45  ;;  %v115_v52 = vld [vmem:[#allocation5 + $0x220] sm:$0xff] }
  0x41   :  { %540 = vmatprep.subr.bf16.mxu1 %v539_v18  ;;  %v555_v51 = vpack.c.bf16 %v132_v48, %v131_v47  ;;  %v116_v53 = vld [vmem:[#allocation5 + $0x228] sm:$0xff]  ;;  %v133_v54 = vld [vmem:[#allocation5 + $0x2b0] sm:$0xff]  ;;  %v134_v55 = vld [vmem:[#allocation5 + $0x2b8] sm:$0xff] }
  0x42   :  { %510 = vmatpush3.bf16.msra.mxu0 %v509_v24  ;;  %v557_v56 = vpack.c.bf16 %v116_v53, %v115_v52  ;;  %v559_v57 = vpack.c.bf16 %v134_v55, %v133_v54  ;;  %v117_v58 = vld [vmem:[#allocation5 + $0x230] sm:$0xff]  ;;  %v118_v59 = vld [vmem:[#allocation5 + $0x238] sm:$0xff]  ;;  %v135_v60 = vld [vmem:[#allocation5 + $0x2c0] sm:$0xff] }
  0x43   :  { %512 = vmatprep.subr.bf16.mxu0 %v511_v26  ;;  %v136_v61 = vld [vmem:[#allocation5 + $0x2c8] sm:$0xff]  ;;  %v561_v62 = vpack.c.bf16 %v118_v59, %v117_v58  ;;  %v119_v0 = vld [vmem:[#allocation5 + $0x240] sm:$0xff]  ;;  %v137_v2 = vld [vmem:[#allocation5 + $0x2d0] sm:$0xff] }
  0x44   :  { %542 = vmatpush3.bf16.msra.mxu1 %v541_v25  ;;  %v563_v63 = vpack.c.bf16 %v136_v61, %v135_v60  ;;  %v120_v1 = vld [vmem:[#allocation5 + $0x248] sm:$0xff]  ;;  %v138_v3 = vld [vmem:[#allocation5 + $0x2d8] sm:$0xff]  ;;  %v121_v6 = vld [vmem:[#allocation5 + $0x250] sm:$0xff] }
  0x45   :  { %544 = vmatprep.subr.bf16.mxu1 %v543_v30  ;;  %v565_v4 = vpack.c.bf16 %v120_v1, %v119_v0  ;;  %v567_v5 = vpack.c.bf16 %v138_v3, %v137_v2  ;;  %v122_v7 = vld [vmem:[#allocation5 + $0x258] sm:$0xff]  ;;  %v139_v8 = vld [vmem:[#allocation5 + $0x2e0] sm:$0xff]  ;;  %v140_v9 = vld [vmem:[#allocation5 + $0x2e8] sm:$0xff] }
  0x46   :  { %514 = vmatpush3.bf16.msra.mxu0 %v513_v34  ;;  %v569_v10 = vpack.c.bf16 %v122_v7, %v121_v6  ;;  %v571_v11 = vpack.c.bf16 %v140_v9, %v139_v8  ;;  %v123_v12 = vld [vmem:[#allocation5 + $0x260] sm:$0xff]  ;;  %v124_v13 = vld [vmem:[#allocation5 + $0x268] sm:$0xff]  ;;  %v141_v14 = vld [vmem:[#allocation5 + $0x2f0] sm:$0xff] }
  0x47   :  { %548 = vmatprep.subr.bf16.mxu0 %v547_v36  ;;  %v142_v15 = vld [vmem:[#allocation5 + $0x2f8] sm:$0xff]  ;;  %v573_v16 = vpack.c.bf16 %v124_v13, %v123_v12  ;;  %v125_v18 = vld [vmem:[#allocation5 + $0x270] sm:$0xff] }
  0x48   :  { %546 = vmatpush3.bf16.msra.mxu1 %v545_v35  ;;  %v575_v17 = vpack.c.bf16 %v142_v15, %v141_v14  ;;  %v126_v19 = vld [vmem:[#allocation5 + $0x278] sm:$0xff]  ;;  %v45_v21 = vld [vmem:[#allocation2 + $0x20] sm:$0xff] }
  0x49   :  { %215 = vmatmul.mubr.f32.vlgmr.msra.gmra.mrb[0].mxu0 %v41_v41  ;;  %v577_v20 = vpack.c.bf16 %v126_v19, %v125_v18  ;;  %v377_v23 = vld [vmem:[%s729_s2] ss:$0 sm:$0xff] }
  0x4a   :  { %550 = vmatpush3.bf16.msra.mxu0 %v549_v42  ;;  %354 = vmatprep.mubr.f32.mxu0 %v46_v49 }
  0x4b   :  { %285 = vmatmul.mubr.f32.vlgmr.msra.gmra.mrb[0].mxu1 %v43_v43  ;;  %552 = vmatprep.subr.bf16.mxu0 %v551_v44 }
  0x4e   :  { %554 = vmatpush3.bf16.msra.mxu0 %v553_v50 }
  0x4f   :  { %556 = vmatprep.subr.bf16.mxu0 %v555_v51 }
  0x52   :  { %558 = vmatpush3.bf16.msra.mxu0 %v557_v56 }
  0x53   :  { %560 = vmatprep.subr.bf16.mxu0 %v559_v57 }
  0x56   :  { %562 = vmatpush3.bf16.msra.mxu0 %v561_v62 }
  0x57   :  { %564 = vmatprep.subr.bf16.mxu0 %v563_v63 }
  0x5a   :  { %566 = vmatpush3.bf16.msra.mxu0 %v565_v4 }
  0x5b   :  { %568 = vmatprep.subr.bf16.mxu0 %v567_v5 }
  0x5e   :  { %570 = vmatpush3.bf16.msra.mxu0 %v569_v10 }
  0x5f   :  { %572 = vmatprep.subr.bf16.mxu0 %v571_v11 }
  0x62   :  { %574 = vmatpush3.bf16.msra.mxu0 %v573_v16 }
  0x63   :  { %576 = vmatprep.subr.bf16.mxu0 %v575_v17 }
  0x66   :  { %578 = vmatpush3.bf16.msra.mxu0 %v577_v20 }
  0x69   :  { %355 = vmatmul.mubr.f32.vlgmr.msra.gmra.mrb[2].mxu0 %v45_v21 }
 0x11c   :  { %v410_v22 = vpop.f32.mrb[0].mxu0 }
 0x11d   :  { %v411_v24 = vpop.f32.mrb[1].mxu0 }
 0x11e   :  { %v445_v25 = vpop.f32.mrb[0].mxu1  ;;  %v412_v26 = vadd.f32 %v411_v24, %v410_v22 }
 0x11f   :  { %v446_v27 = vpop.f32.mrb[1].mxu1 }
 0x120   :  { %v447_v28 = vadd.f32 %v446_v27, %v445_v25  ;;  %v217_v29 = vadd.f32 %v412_v26, %v377_v23 }
 0x122   :  { %v287_v30 = vadd.f32 %v447_v28, %v217_v29 }
 0x13c   :  { %v480_v31 = vpop.f32.mrb[2].mxu0 }
 0x13d   :  { %v481_v32 = vpop.f32.mrb[3].mxu0 }
 0x13e   :  { %v482_v33 = vadd.f32 %v481_v32, %v480_v31 }
 0x140   :  { %v357_v34 = vadd.f32 %v482_v33, %v287_v30 }
 0x142   :  { %360 = vst [vmem:[#allocation7] sm:$0xff] %v357_v34 }
 0x143   :  { %639 = shalt.err (!%p636_p6)
}
 0x144   :  { %s640_s15 = scalar_lea.hbm %s730_s3, 128 }
 0x145   :  { %p641_p7 = scmp.ne.s32.totalorder %s730_s3, %s640_s15  ;;  %p644_p8 = scmp.lt.u32.totalorder %s640_s15, %s730_s3 }
 0x147   :  { %p646_p9 = pnand %p644_p8, %p641_p7 }
 0x149   :  { %649 = shalt.err (!%p646_p9)
}
 0x14a   :  { %370 = dma.vmem_to_hbm [thread:$0]  %s368_s12, 128, %s730_s3, [#allocation4]  }
 0x14b   :  { %654 = dma.done.wait [#allocation4], 128  }
 0x14c   :  { %655 = vsyncadd [#allocation4], 4294967168 }
 0x14d   :  { %374 = vsyncpa [#allocation3], 1 }
 0x14e   :  { %375 = vsyncpa [#allocation6], 1 }
 0x14f   :  { %376 = vsyncpa [#allocation4], 1 }

</bundles_post_ra>
